<compile_context>
chip_gen: v7x
topology: tpu7x:2x2x1
jax: 0.10.0
libtpu: 0.0.40
codegen_flags: <defaults>
</compile_context>

<pallas_src>
import functools

import jax
import jax.numpy as jnp
from jax.experimental import pallas as pl
from jax.experimental.pallas import tpu as pltpu


def _label_smooth_ce_kernel(pred_ref, label_ref, out_ref,
                            m_ref, l_ref, dot_ref,
                            *, smoothing, num_classes):
    """Grid = (row tiles, class tiles); class axis is the (last) reduction axis."""
    k = pl.program_id(1)

    @pl.when(k == 0)
    def _():
        m_ref[...] = jnp.full_like(m_ref, -jnp.inf)
        l_ref[...] = jnp.zeros_like(l_ref)
        dot_ref[...] = jnp.zeros_like(dot_ref)

    pred = pred_ref[...].astype(jnp.float32)       # (TN, TC); compute in f32
    label = label_ref[...]                         # (TN, 1) int32
    tn, tc = pred.shape

    # Global class index of each lane in this tile; mask out class padding.
    cidx = k * tc + jax.lax.broadcasted_iota(jnp.int32, (tn, tc), 1)
    valid = cidx < num_classes

    # ---- online logsumexp over the class axis --------------------------------
    pm = jnp.where(valid, pred, -jnp.inf)          # padded classes contribute 0
    m_prev = m_ref[...]
    m_new = jnp.maximum(m_prev, jnp.max(pm, axis=1, keepdims=True))
    l_ref[...] = (l_ref[...] * jnp.exp(m_prev - m_new)
                  + jnp.sum(jnp.exp(pm - m_new), axis=1, keepdims=True))
    m_ref[...] = m_new

    # ---- <smoothed target, logits> without materializing a one-hot ----------
    lab_term = jnp.sum(jnp.where(cidx == label, pred, 0.0), axis=1, keepdims=True)
    sum_term = jnp.sum(jnp.where(valid, pred, 0.0), axis=1, keepdims=True)
    dot_ref[...] += ((1.0 - smoothing) * lab_term
                     + (smoothing / num_classes) * sum_term)

    # ---- finalize: per-row loss = logsumexp - dot ----------------------------
    @pl.when(k == pl.num_programs(1) - 1)
    def _():
        lse = m_ref[...] + jnp.log(l_ref[...])
        out_ref[...] = lse - dot_ref[...]


def _round_up(x, m):
    return (x + m - 1) // m * m


def label_smooth_ce_loss(pred, label, smoothing=0.1,
                         block_rows=256, block_cols=512):
    """pred: (N, C) logits (any float dtype), label: (N,) int class ids -> scalar f32.

    block_rows must be a multiple of 8, block_cols a multiple of 128.
    """
    n, c = pred.shape
    label2d = label.astype(jnp.int32).reshape(n, 1)

    # Tile selection: use the full extent when it fits a single tile, otherwise
    # a lane-dense tile and pad the array up to the tile grid (masked in-kernel).
    if c <= block_cols:
        tc, c_pad = c, c
    else:
        tc, c_pad = block_cols, _round_up(c, block_cols)
    if n <= block_rows:
        tn, n_pad = n, n
    else:
        tn, n_pad = block_rows, _round_up(n, block_rows)

    if (n_pad, c_pad) != (n, c):
        pred = jnp.pad(pred, ((0, n_pad - n), (0, c_pad - c)))
        label2d = jnp.pad(label2d, ((0, n_pad - n), (0, 0)))

    grid = (n_pad // tn, c_pad // tc)

    cost = pl.CostEstimate(
        flops=8 * n * c,                       # cmp/select/mul-add passes
        transcendentals=n * c,                 # one exp per logit
        bytes_accessed=pred.size * pred.dtype.itemsize + 4 * n + 4 * n,
    )

    per_row = pl.pallas_call(
        functools.partial(_label_smooth_ce_kernel,
                          smoothing=float(smoothing), num_classes=c),
        out_shape=jax.ShapeDtypeStruct((n_pad, 1), jnp.float32),
        grid_spec=pltpu.PrefetchScalarGridSpec(
            num_scalar_prefetch=0,
            grid=grid,
            in_specs=[
                pl.BlockSpec((tn, tc), lambda i, k: (i, k)),   # logits tile
                pl.BlockSpec((tn, 1), lambda i, k: (i, 0)),    # labels (per row)
            ],
            out_specs=pl.BlockSpec((tn, 1), lambda i, k: (i, 0)),
            scratch_shapes=[
                pltpu.VMEM((tn, 1), jnp.float32),   # running row max
                pltpu.VMEM((tn, 1), jnp.float32),   # running sum(exp)
                pltpu.VMEM((tn, 1), jnp.float32),   # running <smooth_label, pred>
            ],
        ),
        compiler_params=pltpu.CompilerParams(
            dimension_semantics=("parallel", "arbitrary"),
            vmem_limit_bytes=32 * 1024 * 1024,
        ),
        cost_estimate=cost,
    )(pred, label2d)

    # Final batch mean over the real (unpadded) rows; trivial N-element reduce.
    return jnp.sum(per_row[:n, 0]) / n


def _ref_loss(pred, label, smoothing=0.1):
    """Pure-JAX reference matching the PyTorch module's math."""
    pred = pred.astype(jnp.float32)
    c = pred.shape[1]
    logp = jax.nn.log_softmax(pred, axis=1)
    oh = jax.nn.one_hot(label, c, dtype=jnp.float32)
    sl = (1.0 - smoothing) * oh + smoothing / c
    return jnp.mean(jnp.sum(-logp * sl, axis=1))


if __name__ == "__main__":
    key = jax.random.PRNGKey(0)
    k1, k2, k3, k4, k5, k6 = jax.random.split(key, 6)

    # Case 1: tiny shape, single tile (matches the module's toy usage).
    n1, c1 = 8, 16
    p1 = jax.random.normal(k1, (n1, c1), dtype=jnp.float32)
    l1 = jax.random.randint(k2, (n1,), 0, c1, dtype=jnp.int32)
    loss1 = label_smooth_ce_loss(p1, l1, smoothing=0.1)
    jax.block_until_ready(loss1)
    assert jnp.allclose(loss1, _ref_loss(p1, l1, 0.1), rtol=1e-5, atol=1e-5), loss1

    # Case 2: bf16 logits fed straight through, class axis tiled + ragged (masked).
    n2, c2 = 16, 300
    p2 = jax.random.normal(k3, (n2, c2), dtype=jnp.float32).astype(jnp.bfloat16)
    l2 = jax.random.randint(k4, (n2,), 0, c2, dtype=jnp.int32)
    loss2 = label_smooth_ce_loss(p2, l2, smoothing=0.1, block_cols=128)
    jax.block_until_ready(loss2)
    assert jnp.allclose(loss2, _ref_loss(p2, l2, 0.1), rtol=1e-4, atol=1e-4), loss2

    # Case 3: both axes tiled (exercises row-parallel grid + online logsumexp).
    n3, c3 = 24, 300
    p3 = 3.0 * jax.random.normal(k5, (n3, c3), dtype=jnp.float32)
    l3 = jax.random.randint(k6, (n3,), 0, c3, dtype=jnp.int32)
    loss3 = label_smooth_ce_loss(p3, l3, smoothing=0.1, block_rows=8, block_cols=128)
    jax.block_until_ready(loss3)
    assert jnp.allclose(loss3, _ref_loss(p3, l3, 0.1), rtol=1e-5, atol=1e-5), loss3

    print("KERNEL_OK")
</pallas_src>

<mosaic_0001>
module attributes {stable_mosaic.version = 11 : i64} {
  func.func @_label_smooth_ce_kernel(%arg0: i32, %arg1: i32, %arg2: memref<8x16xf32, #tpu.memory_space<vmem>>, %arg3: memref<8x1xi32, #tpu.memory_space<vmem>>, %arg4: memref<8x1xf32, #tpu.memory_space<vmem>>, %arg5: memref<8x1xf32, #tpu.memory_space<vmem>>, %arg6: memref<8x1xf32, #tpu.memory_space<vmem>>, %arg7: memref<8x1xf32, #tpu.memory_space<vmem>>) attributes {dimension_semantics = [#tpu.dimension_semantics<parallel>, #tpu.dimension_semantics<arbitrary>], iteration_bounds = array<i64: 1, 1>, scalar_prefetch = 0 : i64, scratch_operands = 3 : i64, tpu.core_type = #tpu.core_type<tc>, window_params = [{transform_indices = @transform_0, window_bounds = array<i64: 8, 16>}, {transform_indices = @transform_1, window_bounds = array<i64: 8, 1>}, {transform_indices = @transform_2, window_bounds = array<i64: 8, 1>}]} {
    %c0_i32 = arith.constant 0 : i32
    %0 = arith.cmpi eq, %arg1, %c0_i32 : i32
    %1 = arith.extui %0 : i1 to i32
    %c0_i32_0 = arith.constant 0 : i32
    %2 = arith.cmpi ne, %1, %c0_i32_0 : i32
    scf.if %2 {
      %cst_27 = arith.constant 0xFF800000 : f32
      %50 = vector.broadcast %cst_27 : f32 to vector<8x1xf32>
      %c0_28 = arith.constant 0 : index
      %c0_29 = arith.constant 0 : index
      %51 = vector.load %arg5[%c0_28, %c0_29] : memref<8x1xf32, #tpu.memory_space<vmem>>, vector<8x1xf32>
      tpu.vector_store %arg5[%c0_28, %c0_29], %50 {strides = array<i32>} : memref<8x1xf32, #tpu.memory_space<vmem>>, vector<8x1xf32>,
      %cst_30 = arith.constant 0.000000e+00 : f32
      %52 = vector.broadcast %cst_30 : f32 to vector<8x1xf32>
      %c0_31 = arith.constant 0 : index
      %c0_32 = arith.constant 0 : index
      %53 = vector.load %arg6[%c0_31, %c0_32] : memref<8x1xf32, #tpu.memory_space<vmem>>, vector<8x1xf32>
      tpu.vector_store %arg6[%c0_31, %c0_32], %52 {strides = array<i32>} : memref<8x1xf32, #tpu.memory_space<vmem>>, vector<8x1xf32>,
      %cst_33 = arith.constant 0.000000e+00 : f32
      %54 = vector.broadcast %cst_33 : f32 to vector<8x1xf32>
      %c0_34 = arith.constant 0 : index
      %c0_35 = arith.constant 0 : index
      %55 = vector.load %arg7[%c0_34, %c0_35] : memref<8x1xf32, #tpu.memory_space<vmem>>, vector<8x1xf32>
      tpu.vector_store %arg7[%c0_34, %c0_35], %54 {strides = array<i32>} : memref<8x1xf32, #tpu.memory_space<vmem>>, vector<8x1xf32>,
    } else {
    }
    %c0 = arith.constant 0 : index
    %c0_1 = arith.constant 0 : index
    %3 = vector.load %arg2[%c0, %c0_1] : memref<8x16xf32, #tpu.memory_space<vmem>>, vector<8x16xf32>
    %c0_2 = arith.constant 0 : index
    %c0_3 = arith.constant 0 : index
    %4 = vector.load %arg3[%c0_2, %c0_3] : memref<8x1xi32, #tpu.memory_space<vmem>>, vector<8x1xi32>
    %c16_i32 = arith.constant 16 : i32
    %5 = arith.muli %arg1, %c16_i32 : i32
    %6 = tpu.iota {dimensions = array<i32: 1>} : vector<8x16xi32>
    %7 = vector.broadcast %5 : i32 to vector<8x16xi32>
    %8 = arith.addi %7, %6 : vector<8x16xi32>
    %c16_i32_4 = arith.constant 16 : i32
    %9 = vector.broadcast %c16_i32_4 : i32 to vector<8x16xi32>
    %10 = arith.cmpi slt, %8, %9 : vector<8x16xi32>
    %cst = arith.constant 0xFF800000 : f32
    %11 = vector.broadcast %cst : f32 to vector<8x16xf32>
    %12 = arith.select %10, %3, %11 : vector<8x16xi1>, vector<8x16xf32>
    %c0_5 = arith.constant 0 : index
    %c0_6 = arith.constant 0 : index
    %13 = vector.load %arg5[%c0_5, %c0_6] : memref<8x1xf32, #tpu.memory_space<vmem>>, vector<8x1xf32>
    %cst_7 = arith.constant dense<0xFF800000> : vector<8xf32>
    %14 = vector.multi_reduction <maximumf>, %12, %cst_7 [1] : vector<8x16xf32> to vector<8xf32>
    %15 = vector.shape_cast %14 : vector<8xf32> to vector<8x1xf32>
    %16 = arith.maximumf %13, %15 : vector<8x1xf32>
    %c0_8 = arith.constant 0 : index
    %c0_9 = arith.constant 0 : index
    %17 = vector.load %arg6[%c0_8, %c0_9] : memref<8x1xf32, #tpu.memory_space<vmem>>, vector<8x1xf32>
    %18 = arith.subf %13, %16 : vector<8x1xf32>
    %19 = math.exp %18 : vector<8x1xf32>
    %20 = arith.mulf %17, %19 : vector<8x1xf32>
    %21 = vector.broadcast %16 : vector<8x1xf32> to vector<8x16xf32>
    %22 = arith.subf %12, %21 : vector<8x16xf32>
    %23 = math.exp %22 : vector<8x16xf32>
    %cst_10 = arith.constant dense<0.000000e+00> : vector<8xf32>
    %24 = vector.multi_reduction <add>, %23, %cst_10 [1] : vector<8x16xf32> to vector<8xf32>
    %25 = vector.shape_cast %24 : vector<8xf32> to vector<8x1xf32>
    %26 = arith.addf %20, %25 : vector<8x1xf32>
    %c0_11 = arith.constant 0 : index
    %c0_12 = arith.constant 0 : index
    %27 = vector.load %arg6[%c0_11, %c0_12] : memref<8x1xf32, #tpu.memory_space<vmem>>, vector<8x1xf32>
    tpu.vector_store %arg6[%c0_11, %c0_12], %26 {strides = array<i32>} : memref<8x1xf32, #tpu.memory_space<vmem>>, vector<8x1xf32>,
    %c0_13 = arith.constant 0 : index
    %c0_14 = arith.constant 0 : index
    %28 = vector.load %arg5[%c0_13, %c0_14] : memref<8x1xf32, #tpu.memory_space<vmem>>, vector<8x1xf32>
    tpu.vector_store %arg5[%c0_13, %c0_14], %16 {strides = array<i32>} : memref<8x1xf32, #tpu.memory_space<vmem>>, vector<8x1xf32>,
    %29 = vector.broadcast %4 : vector<8x1xi32> to vector<8x16xi32>
    %30 = arith.cmpi eq, %8, %29 : vector<8x16xi32>
    %cst_15 = arith.constant 0.000000e+00 : f32
    %31 = vector.broadcast %cst_15 : f32 to vector<8x16xf32>
    %32 = arith.select %30, %3, %31 : vector<8x16xi1>, vector<8x16xf32>
    %cst_16 = arith.constant dense<0.000000e+00> : vector<8xf32>
    %33 = vector.multi_reduction <add>, %32, %cst_16 [1] : vector<8x16xf32> to vector<8xf32>
    %34 = vector.shape_cast %33 : vector<8xf32> to vector<8x1xf32>
    %cst_17 = arith.constant 0.000000e+00 : f32
    %35 = vector.broadcast %cst_17 : f32 to vector<8x16xf32>
    %36 = arith.select %10, %3, %35 : vector<8x16xi1>, vector<8x16xf32>
    %cst_18 = arith.constant dense<0.000000e+00> : vector<8xf32>
    %37 = vector.multi_reduction <add>, %36, %cst_18 [1] : vector<8x16xf32> to vector<8xf32>
    %38 = vector.shape_cast %37 : vector<8xf32> to vector<8x1xf32>
    %c0_19 = arith.constant 0 : index
    %c0_20 = arith.constant 0 : index
    %39 = vector.load %arg7[%c0_19, %c0_20] : memref<8x1xf32, #tpu.memory_space<vmem>>, vector<8x1xf32>
    %cst_21 = arith.constant 0.899999976 : f32
    %40 = vector.broadcast %cst_21 : f32 to vector<8x1xf32>
    %41 = arith.mulf %40, %34 : vector<8x1xf32>
    %cst_22 = arith.constant 6.250000e-03 : f32
    %42 = vector.broadcast %cst_22 : f32 to vector<8x1xf32>
    %43 = arith.mulf %42, %38 : vector<8x1xf32>
    %44 = arith.addf %41, %43 : vector<8x1xf32>
    %45 = arith.addf %39, %44 : vector<8x1xf32>
    %c0_23 = arith.constant 0 : index
    %c0_24 = arith.constant 0 : index
    %46 = vector.load %arg7[%c0_23, %c0_24] : memref<8x1xf32, #tpu.memory_space<vmem>>, vector<8x1xf32>
    tpu.vector_store %arg7[%c0_23, %c0_24], %45 {strides = array<i32>} : memref<8x1xf32, #tpu.memory_space<vmem>>, vector<8x1xf32>,
    %c0_i32_25 = arith.constant 0 : i32
    %47 = arith.cmpi eq, %arg1, %c0_i32_25 : i32
    %48 = arith.extui %47 : i1 to i32
    %c0_i32_26 = arith.constant 0 : i32
    %49 = arith.cmpi ne, %48, %c0_i32_26 : i32
    scf.if %49 {
      %c0_27 = arith.constant 0 : index
      %c0_28 = arith.constant 0 : index
      %50 = vector.load %arg5[%c0_27, %c0_28] : memref<8x1xf32, #tpu.memory_space<vmem>>, vector<8x1xf32>
      %c0_29 = arith.constant 0 : index
      %c0_30 = arith.constant 0 : index
      %51 = vector.load %arg6[%c0_29, %c0_30] : memref<8x1xf32, #tpu.memory_space<vmem>>, vector<8x1xf32>
      %52 = math.log %51 : vector<8x1xf32>
      %53 = arith.addf %50, %52 : vector<8x1xf32>
      %c0_31 = arith.constant 0 : index
      %c0_32 = arith.constant 0 : index
      %54 = vector.load %arg7[%c0_31, %c0_32] : memref<8x1xf32, #tpu.memory_space<vmem>>, vector<8x1xf32>
      %55 = arith.subf %53, %54 : vector<8x1xf32>
      %c0_33 = arith.constant 0 : index
      %c0_34 = arith.constant 0 : index
      %56 = vector.load %arg4[%c0_33, %c0_34] : memref<8x1xf32, #tpu.memory_space<vmem>>, vector<8x1xf32>
      tpu.vector_store %arg4[%c0_33, %c0_34], %55 {strides = array<i32>} : memref<8x1xf32, #tpu.memory_space<vmem>>, vector<8x1xf32>,
    } else {
    }
    return
  }
  func.func @transform_0(%arg0: i32, %arg1: i32) -> (i32, i32) {
    %c0_i32 = arith.constant 0 : i32
    return %arg0, %arg1 : i32, i32
  }
  func.func @transform_1(%arg0: i32, %arg1: i32) -> (i32, i32) {
    %c0_i32 = arith.constant 0 : i32
    %c0_i32_0 = arith.constant 0 : i32
    return %arg0, %c0_i32 : i32, i32
  }
  func.func @transform_2(%arg0: i32, %arg1: i32) -> (i32, i32) {
    %c0_i32 = arith.constant 0 : i32
    %c0_i32_0 = arith.constant 0 : i32
    return %arg0, %c0_i32 : i32, i32
  }
}

</mosaic_0001>

<bundles_post_ra>
// kernel: tpu_custom_call.1
= control target key start
LH: loop header
LB: loop body
LE: loop exit
PB: predicated region body
PF: predicated region fallthrough
CT: control target
= control target key end

     0   :  { %v22_v0 = vlaneseq  ;;  %vm15_vm0 = vcmask 7168   ;;  %v98_v1 = vmov -inf   ;;  %vm29_vm1 = vcmask 130048   ;;  %s138_s0 = inlined_call_operand.vmem [shape: f32[8,16], index: 0, kind: input, shape index: {}]   ;;  %s139_s1 = inlined_call_operand.vmem [shape: s32[8,1], index: 1, kind: input, shape index: {}]   ;;  %s140_s2 = inlined_call_operand.vmem [shape: f32[8,1], index: 2, kind: output, shape index: {}]  }
   0x1   :  { %16 = vst.msk [vmem:[#allocation2] sm:$0xff] %vm15_vm0, %v98_v1  ;;  %v19_v2 = vld [vmem:[%s138_s0] sm:$0xff]  ;;  %v99_v6 = vmov 0   ;;  %v100_v7 = vmov 0.0  }
   0x2   :  { %v23_v3 = vand.u32 127, %v22_v0  ;;  %90 = vset.pattern.permute.xlu0 %v99_v6  ;;  %91 = vset.pattern.permute.xlu1 %v99_v6  ;;  %17 = vst.msk [vmem:[#allocation3] sm:$0xff] %vm15_vm0, %v100_v7  ;;  %18 = vst.msk [vmem:[#allocation4] sm:$0xff] %vm15_vm0, %v100_v7  ;;  %v20_v8 = vld [vmem:[%s139_s1] sm:$0xff] }
   0x3   :  { %55 = vperm.xlu1 %91, %v20_v8  }
   0x4   :  { %vm26_vm2 = vcmp.lt.s32.totalorder %v23_v3, 16 }
   0x5   :  { %v27_v4 = vsel %vm26_vm2, %v19_v2, -inf  ;;  %v62_v21 = vsel %vm26_vm2, %v19_v2, 0.0 }
   0x6   :  { %v30_v5 = vsel %vm29_vm1, %v27_v4, -inf  ;;  %v63_v22 = vsel %vm29_vm1, %v62_v21, 0.0 }
   0x7   :  { %31 = vmax.xlane.f32.xlu0 %v30_v5 }
   0x8   :  { %v28_v9 = vld [vmem:[#allocation2] sm:$0xff] }
   0x9   :  { %v34_v25 = vld [vmem:[#allocation3] sm:$0xff]  ;;  %v66_v34 = vld [vmem:[#allocation4] sm:$0xff] }
  0x82   :  { %v56_v16 = vpop.permute.xlu1 %55 }
  0x83   :  { %vm57_vm3 = vcmp.eq.s32.totalorder %v23_v3, %v56_v16 }
  0x84   :  { %v58_v18 = vsel %vm57_vm3, %v19_v2, 0.0 }
  0x85   :  { %v59_v20 = vsel %vm29_vm1, %v58_v18, 0.0 }
  0x94   :  { %v32_v10 = vpop.xlane.xlu0 %31 }
  0x95   :  { %v33_v11 = vmax.f32 %v28_v9, %v32_v10 }
  0x97   :  { %v35_v12 = vsub.f32 %v28_v9, %v33_v11  ;;  %53 = vst.msk [vmem:[#allocation2] sm:$0xff] %vm15_vm0, %v33_v11  ;;  %41 = vperm.xlu0 %90, %v33_v11  }
  0x99   :  { %v36_v23 = vmul.f32 1.442695, %v35_v12 }
  0x9e   :  { %v75_v39 = vld [vmem:[#allocation2] sm:$0xff] }
 0x116   :  { %v42_v13 = vpop.permute.xlu0 %41 }
 0x117   :  { %v44_v14 = vsub.f32 %v27_v4, %v42_v13 }
 0x119   :  { %v45_v15 = vmul.f32 1.442695, %v44_v14 }
 0x11b   :  { %92 = vpow2.f32 %v45_v15 }
 0x11c   :  { %94 = vpow2.f32 %v36_v23 }
 0x125   :  { %v93_v17 = vpop.eup %92 }
 0x126   :  { %v47_v19 = vsel %vm29_vm1, %v93_v17, 0.0  ;;  %v95_v24 = vpop.eup %94 }
 0x127   :  { %48 = vadd.xlane.f32.xlu1 %v47_v19  ;;  %v38_v26 = vmul.f32 %v95_v24, %v34_v25 }
 0x12b   :  { %60 = vadd.xlane.f32.xlu1 %v59_v20 }
 0x12f   :  { %64 = vadd.xlane.f32.xlu1 %v63_v22 }
 0x1b4   :  { %v49_v27 = vpop.xlane.xlu1 %48 }
 0x1b5   :  { %v50_v28 = vadd.f32 %v49_v27, %v38_v26 }
 0x1b7   :  { %52 = vst.msk [vmem:[#allocation3] sm:$0xff] %vm15_vm0, %v50_v28 }
 0x1b8   :  { %v61_v29 = vpop.xlane.xlu1 %60 }
 0x1b9   :  { %v67_v30 = vmul.f32 0.9, %v61_v29 }
 0x1bc   :  { %v65_v31 = vpop.xlane.xlu1 %64 }
 0x1bd   :  { %v68_v32 = vmul.f32 0.00625, %v65_v31 }
 0x1be   :  { %v76_v33 = vld [vmem:[#allocation3] sm:$0xff] }
 0x1bf   :  { %96 = vlog2.f32 %v76_v33  ;;  %v69_v35 = vadd.f32 %v68_v32, %v67_v30 }
 0x1c1   :  { %v70_v36 = vadd.f32 %v69_v35, %v66_v34 }
 0x1c3   :  { %71 = vst.msk [vmem:[#allocation4] sm:$0xff] %vm15_vm0, %v70_v36 }
 0x1c9   :  { %v97_v37 = vpop.eup %96 }
 0x1ca   :  { %v78_v38 = vmul.f32 0.6931472, %v97_v37  ;;  %v80_v41 = vld [vmem:[#allocation4] sm:$0xff] }
 0x1cc   :  { %v79_v40 = vadd.f32 %v78_v38, %v75_v39 }
 0x1ce   :  { %v81_v42 = vsub.f32 %v79_v40, %v80_v41 }
 0x1d0   :  { %82 = vst.msk [vmem:[%s140_s2] sm:$0xff] %vm15_vm0, %v81_v42 }

</bundles_post_ra>
